<compile_context>
chip_gen: v5e
topology: v5e:2x2
jax: 0.10.0
libtpu: 0.0.40
codegen_flags: <defaults>
</compile_context>

<pallas_src>
import functools

import jax
import jax.numpy as jnp
from jax import lax
from jax.experimental import pallas as pl
from jax.experimental.pallas import tpu as pltpu


def _round_up(x, m):
    return ((x + m - 1) // m) * m


# ----------------------------------------------------------------------------
# Kernel 1: both linear heads + masked cross-entropy (ignore_index=-100),
# fused, with an online-softmax over streamed vocab tiles.
# Grid = (num_splits, row_tiles_per_split, 2 heads, vocab_tiles):
#   axis 0 "parallel"  -> per-split partial accumulators (v7x 2-TC sharding),
#   axes 1-3 "arbitrary" -> resident accumulators / online-softmax state.
# ----------------------------------------------------------------------------
def _fused_heads_kernel(x_ref, w_ref, b_ref, lbl_ref,
                        sm_ref, cm_ref, sp_ref, cp_ref,
                        m_ref, l_ref, t_ref,
                        *, tiles_per_split, tile_n, n_valid, exp_bf16):
    c = pl.program_id(0)        # megacore split (parallel)
    i = pl.program_id(1)        # row tile within split
    h = pl.program_id(2)        # head: 0 = mlm, 1 = param
    v = pl.program_id(3)        # vocab tile
    nv = pl.num_programs(3)

    # Zero the resident per-split loss accumulators once per split.
    @pl.when((i == 0) & (h == 0) & (v == 0))
    def _():
        sm_ref[...] = jnp.zeros_like(sm_ref)
        cm_ref[...] = jnp.zeros_like(cm_ref)
        sp_ref[...] = jnp.zeros_like(sp_ref)
        cp_ref[...] = jnp.zeros_like(cp_ref)

    # Reset online-softmax state at the first vocab tile of each (row tile, head).
    @pl.when(v == 0)
    def _():
        m_ref[...] = jnp.full(m_ref.shape, -jnp.inf, jnp.float32)
        l_ref[...] = jnp.zeros_like(l_ref)
        t_ref[...] = jnp.zeros_like(t_ref)

    # One head, one vocab tile of logits per step -> a single live
    # (tile_n, tile_v) f32 buffer.  x cast to bf16 in-kernel (no extra HBM pass).
    x = x_ref[...].astype(jnp.bfloat16)
    logits = jnp.dot(x, w_ref[...], preferred_element_type=jnp.float32) + b_ref[...]

    tile_v = logits.shape[-1]
    lbl = lbl_ref[...]                                    # (tile_n, 1) int32

    m_old = m_ref[...]
    m_new = jnp.maximum(m_old, jnp.max(logits, axis=-1, keepdims=True))
    shifted = logits - m_new
    if exp_bf16:
        # v6e/v7x bf16 EUP path (~2x exp throughput); accumulation stays f32.
        p = jnp.exp(shifted.astype(jnp.bfloat16)).astype(jnp.float32)
    else:
        # v5e and older: f32 EUP only.
        p = jnp.exp(shifted)
    l_ref[...] = l_ref[...] * jnp.exp(m_old - m_new) + jnp.sum(p, axis=-1, keepdims=True)
    m_ref[...] = m_new

    # Target logit: a valid label's column lives in exactly one vocab tile;
    # -100 / padded vocab columns never match.
    col = v * tile_v + lax.broadcasted_iota(jnp.int32, logits.shape, 1)
    t_ref[...] += jnp.sum(jnp.where(col == lbl, logits, 0.0), axis=-1, keepdims=True)

    # Flush this head's masked-CE partial after the last vocab tile only.
    @pl.when(v == nv - 1)
    def _():
        rows = (c * tiles_per_split + i) * tile_n + lax.broadcasted_iota(
            jnp.int32, (tile_n, 1), 0)
        valid = (lbl != -100) & (rows < n_valid)          # ignore_index + ragged tail
        lse = m_ref[...] + jnp.log(l_ref[...])
        per = jnp.where(valid, lse - t_ref[...], 0.0)
        s = jnp.sum(per)
        cnt = jnp.sum(valid.astype(jnp.float32))

        @pl.when(h == 0)
        def _():
            sm_ref[...] += s
            cm_ref[...] += cnt

        @pl.when(h == 1)
        def _():
            sp_ref[...] += s
            cp_ref[...] += cnt


def fused_masked_ce_heads(x, wt_mlm, b_mlm, wt_param, b_param, mlm_lbl, prm_lbl,
                          *, tile_n=None, tile_v=None, num_splits=None,
                          exp_bf16=None):
    """x:[N,D] f32, wt_*:[D,V] f32, b_*:[1,V] f32, *_lbl:[N,1] i32
    -> (mean CE mlm, mean CE param), ignore_index = -100."""
    N, D = x.shape
    V = wt_mlm.shape[1]

    kind = ""
    try:
        kind = jax.devices()[0].device_kind.lower()
    except Exception:
        pass
    if num_splits is None:
        num_splits = 2 if "v7" in kind else 1      # split axis only helps 2-TC chips
    if exp_bf16 is None:
        # bf16 EUP exists on v6e/v7x; older generations have no bf16 exp path.
        exp_bf16 = not any(t in kind for t in ("v2", "v3", "v4", "v5"))
    if tile_n is None:
        tile_n = 256                               # raise to 512-1024 on v6e (128 MiB VMEM)
    if tile_v is None:
        tile_v = 512
    tile_n = _round_up(max(8, min(tile_n, _round_up(N, 8))), 8)
    tile_v = _round_up(max(128, min(tile_v, _round_up(V, 128))), 128)

    nv = pl.cdiv(V, tile_v)
    v_pad = nv * tile_v

    # One-time prep (cheap vs. the [N,D] activations, which are NOT copied or
    # padded): stack both heads, bf16 weights for the MXU, pad vocab columns
    # with a very negative bias so they never win the softmax / match a label.
    w = jnp.stack([wt_mlm, wt_param]).astype(jnp.bfloat16)     # (2, D, V)
    b = jnp.stack([b_mlm, b_param]).astype(jnp.float32)        # (2, 1, V)
    if v_pad != V:
        w = jnp.pad(w, ((0, 0), (0, 0), (0, v_pad - V)))
        b = jnp.pad(b, ((0, 0), (0, 0), (0, v_pad - V)), constant_values=-1e30)
    lbl = jnp.stack([mlm_lbl, prm_lbl]).astype(jnp.int32)      # (2, N, 1)

    total_row_tiles = pl.cdiv(N, tile_n)
    tiles_per_split = pl.cdiv(total_row_tiles, num_splits)
    max_block = total_row_tiles - 1

    def _row_block(c, i):
        # Clamp so dummy iterations (ragged split) fetch an in-bounds tile;
        # their rows are masked in-kernel via the unclamped row index.
        return jnp.minimum(c * tiles_per_split + i, max_block)

    x_map = lambda c, i, h, v: (_row_block(c, i), 0)
    w_map = lambda c, i, h, v: (h, 0, v)
    b_map = lambda c, i, h, v: (h, 0, v)
    lbl_map = lambda c, i, h, v: (h, _row_block(c, i), 0)
    acc_map = lambda c, i, h, v: (c, 0, 0)

    # VMEM budget: double-buffered x/W/b/label tiles + ONE live f32 logits tile
    # + online-softmax scratch; cap at 75% of the chip's VMEM
    # (~96 MiB on v5e/v6e, ~48 MiB on v7x).
    vmem_est = (2 * tile_n * D * 4                 # x tiles (f32, 2 bufs)
                + 2 * D * tile_v * 2               # W tiles (bf16, 2 bufs)
                + 2 * tile_v * 4                   # bias tiles
                + 2 * tile_n * 4                   # label tiles
                + tile_n * tile_v * 4              # one live logits buffer
                + 3 * tile_n * 128 * 4             # m/l/t scratch (lane-padded)
                + (6 << 20))                       # headroom / compiler scratch
    try:
        vmem_cap = int(getattr(pltpu.get_tpu_info(), "vmem_capacity_bytes",
                               128 << 20))
    except Exception:
        vmem_cap = 128 << 20
    vmem_limit = int(min(max(vmem_est, 32 << 20), (vmem_cap * 3) // 4))

    kernel = functools.partial(
        _fused_heads_kernel,
        tiles_per_split=tiles_per_split, tile_n=tile_n,
        n_valid=N, exp_bf16=exp_bf16)

    outs = pl.pallas_call(
        kernel,
        out_shape=tuple(jax.ShapeDtypeStruct((num_splits, 1, 1), jnp.float32)
                        for _ in range(4)),
        grid_spec=pltpu.PrefetchScalarGridSpec(
            num_scalar_prefetch=0,
            grid=(num_splits, tiles_per_split, 2, nv),
            in_specs=[
                pl.BlockSpec((tile_n, D), x_map),                   # x (f32), 1 DMA / row tile
                pl.BlockSpec((pl.Squeezed(), D, tile_v), w_map),    # stacked weights (bf16)
                pl.BlockSpec((pl.Squeezed(), 1, tile_v), b_map),    # stacked biases (f32)
                pl.BlockSpec((pl.Squeezed(), tile_n, 1), lbl_map),  # stacked labels (i32)
            ],
            out_specs=[pl.BlockSpec((1, 1, 1), acc_map) for _ in range(4)],
            scratch_shapes=[pltpu.VMEM((tile_n, 1), jnp.float32)] * 3,
        ),
        compiler_params=pltpu.CompilerParams(
            dimension_semantics=("parallel", "arbitrary", "arbitrary", "arbitrary"),
            vmem_limit_bytes=vmem_limit),
    )(x, w, b, lbl)

    sm, cm, sp, cp = outs
    # NB: matches nn.CrossEntropyLoss(ignore_index=-100): a batch with zero
    # valid labels yields 0/0 = NaN, same as the PyTorch reference.
    loss_mlm = jnp.sum(sm) / jnp.sum(cm)
    loss_param = jnp.sum(sp) / jnp.sum(cp)
    return loss_mlm, loss_param


# ----------------------------------------------------------------------------
# Kernel 2: cosine-similarity matrix * scale + cross-entropy with labels
# arange(B) (in-batch contrastive loss).  Whole-array block, single step.
# ----------------------------------------------------------------------------
def _cos_sim_ce_kernel(a_ref, b_ref, out_ref, *, scale):
    a = a_ref[...].astype(jnp.float32)
    b = b_ref[...].astype(jnp.float32)
    # rsqrt normalization (EUP slot) + bf16 MXU operands, f32 accumulation.
    a_n = (a * lax.rsqrt(jnp.sum(a * a, axis=-1, keepdims=True) + 1e-24)
           ).astype(jnp.bfloat16)
    b_n = (b * lax.rsqrt(jnp.sum(b * b, axis=-1, keepdims=True) + 1e-24)
           ).astype(jnp.bfloat16)

    scores = lax.dot_general(a_n, b_n, (((1,), (1,)), ((), ())),
                             preferred_element_type=jnp.float32) * scale  # (B,B)
    B = scores.shape[0]

    row = lax.broadcasted_iota(jnp.int32, scores.shape, 0)
    col = lax.broadcasted_iota(jnp.int32, scores.shape, 1)
    diag = jnp.sum(jnp.where(row == col, scores, 0.0), axis=-1, keepdims=True)

    m = jnp.max(scores, axis=-1, keepdims=True)
    lse = m + jnp.log(jnp.sum(jnp.exp(scores - m), axis=-1, keepdims=True))

    loss = jnp.sum(lse - diag) / B
    out_ref[...] = jnp.reshape(loss, (1, 1))


def cos_sim_ce(se_a, se_b, scale):
    """se_a, se_b: [B, D] -> scalar CE over scaled cosine similarities."""
    out = pl.pallas_call(
        functools.partial(_cos_sim_ce_kernel, scale=scale),
        out_shape=jax.ShapeDtypeStruct((1, 1), jnp.float32),
        in_specs=[pl.BlockSpec(memory_space=pltpu.MemorySpace.VMEM),
                  pl.BlockSpec(memory_space=pltpu.MemorySpace.VMEM)],
        out_specs=pl.BlockSpec(memory_space=pltpu.MemorySpace.VMEM),
    )(se_a, se_b)
    return out[0, 0]


# ----------------------------------------------------------------------------
# EnhanceLoss forward (token embeddings stand in for model(...)['token_embeddings'])
# ----------------------------------------------------------------------------
def enhance_loss(emb_a, emb_b, wt_mlm, b_mlm, wt_param, b_param,
                 mlm_label, param_label, scale=20.0,
                 tile_n=None, tile_v=None, num_splits=None, exp_bf16=None):
    B, S, D = emb_a.shape
    x = emb_a.reshape(B * S, D)
    mlm_lbl = mlm_label.reshape(B * S, 1).astype(jnp.int32)
    prm_lbl = param_label.reshape(B * S, 1).astype(jnp.int32)

    loss_mlm, loss_param = fused_masked_ce_heads(
        x, wt_mlm, b_mlm, wt_param, b_param, mlm_lbl, prm_lbl,
        tile_n=tile_n, tile_v=tile_v, num_splits=num_splits, exp_bf16=exp_bf16)

    se_a = emb_a[:, 0, :]
    se_b = emb_b[:, 0, :]
    loss_sim = cos_sim_ce(se_a, se_b, scale)
    return loss_mlm + loss_param + loss_sim


# ----------------------------------------------------------------------------
# Pure-JAX reference for verification.  matmul_dtype mirrors the kernel's bf16
# MXU operands (accumulation stays f32) for a tight comparison.
# ----------------------------------------------------------------------------
def reference_loss(emb_a, emb_b, wt_mlm, b_mlm, wt_param, b_param,
                   mlm_label, param_label, scale=20.0,
                   matmul_dtype=jnp.float32):
    B, S, D = emb_a.shape

    def ce_ignore(logits, labels):
        valid = labels != -100
        lse = jax.scipy.special.logsumexp(logits, axis=-1)
        tgt = jnp.take_along_axis(
            logits, jnp.where(valid, labels, 0)[:, None], axis=-1)[:, 0]
        per = jnp.where(valid, lse - tgt, 0.0)
        return jnp.sum(per) / jnp.sum(valid)

    x = emb_a.reshape(-1, D).astype(matmul_dtype).astype(jnp.float32)
    wm = wt_mlm.astype(matmul_dtype).astype(jnp.float32)
    wp = wt_param.astype(matmul_dtype).astype(jnp.float32)
    loss_mlm = ce_ignore(x @ wm + b_mlm[0], mlm_label.reshape(-1))
    loss_param = ce_ignore(x @ wp + b_param[0], param_label.reshape(-1))

    se_a = emb_a[:, 0, :]
    se_b = emb_b[:, 0, :]
    a_n = se_a / jnp.maximum(jnp.linalg.norm(se_a, axis=-1, keepdims=True), 1e-12)
    b_n = se_b / jnp.maximum(jnp.linalg.norm(se_b, axis=-1, keepdims=True), 1e-12)
    a_n = a_n.astype(matmul_dtype).astype(jnp.float32)
    b_n = b_n.astype(matmul_dtype).astype(jnp.float32)
    scores = (a_n @ b_n.T) * scale
    lse = jax.scipy.special.logsumexp(scores, axis=-1)
    tgt = jnp.diag(scores)
    return loss_mlm + loss_param + jnp.mean(lse - tgt)


if __name__ == "__main__":
    B, S, D, V = 2, 8, 32, 128   # batch, seq, sentence_embedding_dimension, vocab
    key = jax.random.PRNGKey(0)
    k = jax.random.split(key, 9)

    emb_a = jax.random.normal(k[0], (B, S, D), dtype=jnp.float32)
    emb_b = jax.random.normal(k[1], (B, S, D), dtype=jnp.float32)

    # deterministic Linear params (mlm / param heads), stored as [D, V] + [1, V]
    wt_mlm = jax.random.normal(k[2], (D, V), dtype=jnp.float32) * 0.05
    b_mlm = jax.random.normal(k[3], (1, V), dtype=jnp.float32) * 0.01
    wt_param = jax.random.normal(k[4], (D, V), dtype=jnp.float32) * 0.05
    b_param = jax.random.normal(k[5], (1, V), dtype=jnp.float32) * 0.01

    # labels in [0, V), with some positions set to ignore_index = -100
    mlm_label = jax.random.randint(k[6], (B, S), 0, V, dtype=jnp.int32)
    param_label = jax.random.randint(k[7], (B, S), 0, V, dtype=jnp.int32)
    ignore_mask = (jax.random.uniform(k[8], (B, S)) < 0.25)
    mlm_label = jnp.where(ignore_mask, -100, mlm_label)
    param_label = jnp.where(jnp.roll(ignore_mask, 1, axis=1), -100, param_label)

    out = enhance_loss(emb_a, emb_b, wt_mlm, b_mlm, wt_param, b_param,
                       mlm_label, param_label, scale=20.0)
    out = jax.block_until_ready(out)

    # Tight check vs. a reference using the same bf16 MXU operand precision
    # (tolerance also covers the optional bf16-exp path on v6e/v7x).
    ref_bf16 = reference_loss(emb_a, emb_b, wt_mlm, b_mlm, wt_param, b_param,
                              mlm_label, param_label, scale=20.0,
                              matmul_dtype=jnp.bfloat16)
    # Loose check vs. the pure-f32 (PyTorch-semantics) reference.
    ref_f32 = reference_loss(emb_a, emb_b, wt_mlm, b_mlm, wt_param, b_param,
                             mlm_label, param_label, scale=20.0,
                             matmul_dtype=jnp.float32)

    assert jnp.isfinite(out), "non-finite loss"
    assert jnp.allclose(out, ref_bf16, rtol=5e-3, atol=5e-3), (out, ref_bf16)
    assert jnp.allclose(out, ref_f32, rtol=3e-2, atol=3e-2), (out, ref_f32)
    print("KERNEL_OK")
</pallas_src>

<mosaic_0001>
module attributes {stable_mosaic.version = 11 : i64} {
  func.func @_fused_heads_kernel(%arg0: i32, %arg1: i32, %arg2: i32, %arg3: i32, %arg4: memref<16x32xf32, #tpu.memory_space<vmem>>, %arg5: memref<1x32x128xbf16, #tpu.memory_space<vmem>>, %arg6: memref<1x1x128xf32, #tpu.memory_space<vmem>>, %arg7: memref<1x16x1xi32, #tpu.memory_space<vmem>>, %arg8: memref<1x1x1xf32, #tpu.memory_space<vmem>>, %arg9: memref<1x1x1xf32, #tpu.memory_space<vmem>>, %arg10: memref<1x1x1xf32, #tpu.memory_space<vmem>>, %arg11: memref<1x1x1xf32, #tpu.memory_space<vmem>>, %arg12: memref<16x1xf32, #tpu.memory_space<vmem>>, %arg13: memref<16x1xf32, #tpu.memory_space<vmem>>, %arg14: memref<16x1xf32, #tpu.memory_space<vmem>>) attributes {dimension_semantics = [#tpu.dimension_semantics<parallel>, #tpu.dimension_semantics<arbitrary>, #tpu.dimension_semantics<arbitrary>, #tpu.dimension_semantics<arbitrary>], iteration_bounds = array<i64: 1, 1, 2, 1>, scalar_prefetch = 0 : i64, scratch_operands = 3 : i64, tpu.core_type = #tpu.core_type<tc>, window_params = [{transform_indices = @transform_0, window_bounds = array<i64: 16, 32>}, {transform_indices = @transform_1, window_bounds = array<i64: 1, 32, 128>}, {transform_indices = @transform_2, window_bounds = array<i64: 1, 1, 128>}, {transform_indices = @transform_3, window_bounds = array<i64: 1, 16, 1>}, {transform_indices = @transform_4, window_bounds = array<i64: 1, 1, 1>}, {transform_indices = @transform_5, window_bounds = array<i64: 1, 1, 1>}, {transform_indices = @transform_6, window_bounds = array<i64: 1, 1, 1>}, {transform_indices = @transform_7, window_bounds = array<i64: 1, 1, 1>}]} {
    %c0_i32 = arith.constant 0 : i32
    %0 = arith.cmpi eq, %arg1, %c0_i32 : i32
    %c0_i32_0 = arith.constant 0 : i32
    %1 = arith.cmpi eq, %arg2, %c0_i32_0 : i32
    %2 = arith.andi %0, %1 : i1
    %c0_i32_1 = arith.constant 0 : i32
    %3 = arith.cmpi eq, %arg3, %c0_i32_1 : i32
    %4 = arith.andi %2, %3 : i1
    %5 = arith.extui %4 : i1 to i32
    %c0_i32_2 = arith.constant 0 : i32
    %6 = arith.cmpi ne, %5, %c0_i32_2 : i32
    scf.if %6 {
      %cst_33 = arith.constant 0.000000e+00 : f32
      %55 = vector.broadcast %cst_33 : f32 to vector<1x1x1xf32>
      %c0_34 = arith.constant 0 : index
      %c0_35 = arith.constant 0 : index
      %c0_36 = arith.constant 0 : index
      %56 = vector.load %arg8[%c0_34, %c0_35, %c0_36] : memref<1x1x1xf32, #tpu.memory_space<vmem>>, vector<1x1x1xf32>
      tpu.vector_store %arg8[%c0_34, %c0_35, %c0_36], %55 {strides = array<i32>} : memref<1x1x1xf32, #tpu.memory_space<vmem>>, vector<1x1x1xf32>,
      %cst_37 = arith.constant 0.000000e+00 : f32
      %57 = vector.broadcast %cst_37 : f32 to vector<1x1x1xf32>
      %c0_38 = arith.constant 0 : index
      %c0_39 = arith.constant 0 : index
      %c0_40 = arith.constant 0 : index
      %58 = vector.load %arg9[%c0_38, %c0_39, %c0_40] : memref<1x1x1xf32, #tpu.memory_space<vmem>>, vector<1x1x1xf32>
      tpu.vector_store %arg9[%c0_38, %c0_39, %c0_40], %57 {strides = array<i32>} : memref<1x1x1xf32, #tpu.memory_space<vmem>>, vector<1x1x1xf32>,
      %cst_41 = arith.constant 0.000000e+00 : f32
      %59 = vector.broadcast %cst_41 : f32 to vector<1x1x1xf32>
      %c0_42 = arith.constant 0 : index
      %c0_43 = arith.constant 0 : index
      %c0_44 = arith.constant 0 : index
      %60 = vector.load %arg10[%c0_42, %c0_43, %c0_44] : memref<1x1x1xf32, #tpu.memory_space<vmem>>, vector<1x1x1xf32>
      tpu.vector_store %arg10[%c0_42, %c0_43, %c0_44], %59 {strides = array<i32>} : memref<1x1x1xf32, #tpu.memory_space<vmem>>, vector<1x1x1xf32>,
      %cst_45 = arith.constant 0.000000e+00 : f32
      %61 = vector.broadcast %cst_45 : f32 to vector<1x1x1xf32>
      %c0_46 = arith.constant 0 : index
      %c0_47 = arith.constant 0 : index
      %c0_48 = arith.constant 0 : index
      %62 = vector.load %arg11[%c0_46, %c0_47, %c0_48] : memref<1x1x1xf32, #tpu.memory_space<vmem>>, vector<1x1x1xf32>
      tpu.vector_store %arg11[%c0_46, %c0_47, %c0_48], %61 {strides = array<i32>} : memref<1x1x1xf32, #tpu.memory_space<vmem>>, vector<1x1x1xf32>,
    } else {
    }
    %c0_i32_3 = arith.constant 0 : i32
    %7 = arith.cmpi eq, %arg3, %c0_i32_3 : i32
    %8 = arith.extui %7 : i1 to i32
    %c0_i32_4 = arith.constant 0 : i32
    %9 = arith.cmpi ne, %8, %c0_i32_4 : i32
    scf.if %9 {
      %cst_33 = arith.constant 0xFF800000 : f32
      %55 = vector.broadcast %cst_33 : f32 to vector<16x1xf32>
      %c0_34 = arith.constant 0 : index
      %c0_35 = arith.constant 0 : index
      %56 = vector.load %arg12[%c0_34, %c0_35] : memref<16x1xf32, #tpu.memory_space<vmem>>, vector<16x1xf32>
      tpu.vector_store %arg12[%c0_34, %c0_35], %55 {strides = array<i32>} : memref<16x1xf32, #tpu.memory_space<vmem>>, vector<16x1xf32>,
      %cst_36 = arith.constant 0.000000e+00 : f32
      %57 = vector.broadcast %cst_36 : f32 to vector<16x1xf32>
      %c0_37 = arith.constant 0 : index
      %c0_38 = arith.constant 0 : index
      %58 = vector.load %arg13[%c0_37, %c0_38] : memref<16x1xf32, #tpu.memory_space<vmem>>, vector<16x1xf32>
      tpu.vector_store %arg13[%c0_37, %c0_38], %57 {strides = array<i32>} : memref<16x1xf32, #tpu.memory_space<vmem>>, vector<16x1xf32>,
      %cst_39 = arith.constant 0.000000e+00 : f32
      %59 = vector.broadcast %cst_39 : f32 to vector<16x1xf32>
      %c0_40 = arith.constant 0 : index
      %c0_41 = arith.constant 0 : index
      %60 = vector.load %arg14[%c0_40, %c0_41] : memref<16x1xf32, #tpu.memory_space<vmem>>, vector<16x1xf32>
      tpu.vector_store %arg14[%c0_40, %c0_41], %59 {strides = array<i32>} : memref<16x1xf32, #tpu.memory_space<vmem>>, vector<16x1xf32>,
    } else {
    }
    %c0 = arith.constant 0 : index
    %c0_5 = arith.constant 0 : index
    %10 = vector.load %arg4[%c0, %c0_5] : memref<16x32xf32, #tpu.memory_space<vmem>>, vector<16x32xf32>
    %11 = arith.truncf %10 : vector<16x32xf32> to vector<16x32xbf16>
    %c0_6 = arith.constant 0 : index
    %c0_7 = arith.constant 0 : index
    %c0_8 = arith.constant 0 : index
    %12 = vector.load %arg5[%c0_6, %c0_7, %c0_8] : memref<1x32x128xbf16, #tpu.memory_space<vmem>>, vector<1x32x128xbf16>
    %13 = vector.shape_cast %12 : vector<1x32x128xbf16> to vector<32x128xbf16>
    %cst = arith.constant dense<0.000000e+00> : vector<16x128xf32>
    %14 = tpu.matmul %11, %13, %cst {dimension_numbers = #tpu.dot_dimension_numbers<[1], [0], [0], [1], [0, 0, 1, 1], [], []>} : vector<16x32xbf16>, vector<32x128xbf16>, vector<16x128xf32> -> vector<16x128xf32>
    %c0_9 = arith.constant 0 : index
    %c0_10 = arith.constant 0 : index
    %c0_11 = arith.constant 0 : index
    %15 = vector.load %arg6[%c0_9, %c0_10, %c0_11] : memref<1x1x128xf32, #tpu.memory_space<vmem>>, vector<1x1x128xf32>
    %16 = vector.shape_cast %15 : vector<1x1x128xf32> to vector<1x128xf32>
    %17 = vector.broadcast %16 : vector<1x128xf32> to vector<16x128xf32>
    %18 = arith.addf %14, %17 : vector<16x128xf32>
    %c0_12 = arith.constant 0 : index
    %c0_13 = arith.constant 0 : index
    %c0_14 = arith.constant 0 : index
    %19 = vector.load %arg7[%c0_12, %c0_13, %c0_14] : memref<1x16x1xi32, #tpu.memory_space<vmem>>, vector<1x16x1xi32>
    %20 = vector.shape_cast %19 : vector<1x16x1xi32> to vector<16x1xi32>
    %c0_15 = arith.constant 0 : index
    %c0_16 = arith.constant 0 : index
    %21 = vector.load %arg12[%c0_15, %c0_16] : memref<16x1xf32, #tpu.memory_space<vmem>>, vector<16x1xf32>
    %cst_17 = arith.constant dense<0xFF800000> : vector<16xf32>
    %22 = vector.multi_reduction <maximumf>, %18, %cst_17 [1] : vector<16x128xf32> to vector<16xf32>
    %23 = vector.shape_cast %22 : vector<16xf32> to vector<16x1xf32>
    %24 = arith.maximumf %21, %23 : vector<16x1xf32>
    %25 = vector.broadcast %24 : vector<16x1xf32> to vector<16x128xf32>
    %26 = arith.subf %18, %25 : vector<16x128xf32>
    %27 = arith.truncf %26 : vector<16x128xf32> to vector<16x128xbf16>
    %28 = math.exp %27 : vector<16x128xbf16>
    %29 = arith.extf %28 : vector<16x128xbf16> to vector<16x128xf32>
    %c0_18 = arith.constant 0 : index
    %c0_19 = arith.constant 0 : index
    %30 = vector.load %arg13[%c0_18, %c0_19] : memref<16x1xf32, #tpu.memory_space<vmem>>, vector<16x1xf32>
    %31 = arith.subf %21, %24 : vector<16x1xf32>
    %32 = math.exp %31 : vector<16x1xf32>
    %33 = arith.mulf %30, %32 : vector<16x1xf32>
    %cst_20 = arith.constant dense<0.000000e+00> : vector<16xf32>
    %34 = vector.multi_reduction <add>, %29, %cst_20 [1] : vector<16x128xf32> to vector<16xf32>
    %35 = vector.shape_cast %34 : vector<16xf32> to vector<16x1xf32>
    %36 = arith.addf %33, %35 : vector<16x1xf32>
    %c0_21 = arith.constant 0 : index
    %c0_22 = arith.constant 0 : index
    %37 = vector.load %arg13[%c0_21, %c0_22] : memref<16x1xf32, #tpu.memory_space<vmem>>, vector<16x1xf32>
    tpu.vector_store %arg13[%c0_21, %c0_22], %36 {strides = array<i32>} : memref<16x1xf32, #tpu.memory_space<vmem>>, vector<16x1xf32>,
    %c0_23 = arith.constant 0 : index
    %c0_24 = arith.constant 0 : index
    %38 = vector.load %arg12[%c0_23, %c0_24] : memref<16x1xf32, #tpu.memory_space<vmem>>, vector<16x1xf32>
    tpu.vector_store %arg12[%c0_23, %c0_24], %24 {strides = array<i32>} : memref<16x1xf32, #tpu.memory_space<vmem>>, vector<16x1xf32>,
    %c128_i32 = arith.constant 128 : i32
    %39 = arith.muli %arg3, %c128_i32 : i32
    %40 = tpu.iota {dimensions = array<i32: 1>} : vector<16x128xi32>
    %41 = vector.broadcast %39 : i32 to vector<16x128xi32>
    %42 = arith.addi %41, %40 : vector<16x128xi32>
    %c0_25 = arith.constant 0 : index
    %c0_26 = arith.constant 0 : index
    %43 = vector.load %arg14[%c0_25, %c0_26] : memref<16x1xf32, #tpu.memory_space<vmem>>, vector<16x1xf32>
    %44 = vector.broadcast %20 : vector<16x1xi32> to vector<16x128xi32>
    %45 = arith.cmpi eq, %42, %44 : vector<16x128xi32>
    %cst_27 = arith.constant 0.000000e+00 : f32
    %46 = vector.broadcast %cst_27 : f32 to vector<16x128xf32>
    %47 = arith.select %45, %18, %46 : vector<16x128xi1>, vector<16x128xf32>
    %cst_28 = arith.constant dense<0.000000e+00> : vector<16xf32>
    %48 = vector.multi_reduction <add>, %47, %cst_28 [1] : vector<16x128xf32> to vector<16xf32>
    %49 = vector.shape_cast %48 : vector<16xf32> to vector<16x1xf32>
    %50 = arith.addf %43, %49 : vector<16x1xf32>
    %c0_29 = arith.constant 0 : index
    %c0_30 = arith.constant 0 : index
    %51 = vector.load %arg14[%c0_29, %c0_30] : memref<16x1xf32, #tpu.memory_space<vmem>>, vector<16x1xf32>
    tpu.vector_store %arg14[%c0_29, %c0_30], %50 {strides = array<i32>} : memref<16x1xf32, #tpu.memory_space<vmem>>, vector<16x1xf32>,
    %c0_i32_31 = arith.constant 0 : i32
    %52 = arith.cmpi eq, %arg3, %c0_i32_31 : i32
    %53 = arith.extui %52 : i1 to i32
    %c0_i32_32 = arith.constant 0 : i32
    %54 = arith.cmpi ne, %53, %c0_i32_32 : i32
    scf.if %54 {
      %c1_i32 = arith.constant 1 : i32
      %55 = arith.muli %arg0, %c1_i32 : i32
      %56 = arith.addi %55, %arg1 : i32
      %c16_i32 = arith.constant 16 : i32
      %57 = arith.muli %56, %c16_i32 : i32
      %58 = tpu.iota {dimensions = array<i32: 0>} : vector<16x1xi32>
      %59 = vector.broadcast %57 : i32 to vector<16x1xi32>
      %60 = arith.addi %59, %58 : vector<16x1xi32>
      %c-100_i32 = arith.constant -100 : i32
      %61 = vector.broadcast %c-100_i32 : i32 to vector<16x1xi32>
      %62 = arith.cmpi ne, %20, %61 : vector<16x1xi32>
      %c16_i32_33 = arith.constant 16 : i32
      %63 = vector.broadcast %c16_i32_33 : i32 to vector<16x1xi32>
      %64 = arith.cmpi slt, %60, %63 : vector<16x1xi32>
      %65 = arith.andi %62, %64 : vector<16x1xi1>
      %c0_34 = arith.constant 0 : index
      %c0_35 = arith.constant 0 : index
      %66 = vector.load %arg12[%c0_34, %c0_35] : memref<16x1xf32, #tpu.memory_space<vmem>>, vector<16x1xf32>
      %c0_36 = arith.constant 0 : index
      %c0_37 = arith.constant 0 : index
      %67 = vector.load %arg13[%c0_36, %c0_37] : memref<16x1xf32, #tpu.memory_space<vmem>>, vector<16x1xf32>
      %68 = math.log %67 : vector<16x1xf32>
      %69 = arith.addf %66, %68 : vector<16x1xf32>
      %c0_38 = arith.constant 0 : index
      %c0_39 = arith.constant 0 : index
      %70 = vector.load %arg14[%c0_38, %c0_39] : memref<16x1xf32, #tpu.memory_space<vmem>>, vector<16x1xf32>
      %71 = arith.subf %69, %70 : vector<16x1xf32>
      %cst_40 = arith.constant 0.000000e+00 : f32
      %72 = vector.broadcast %cst_40 : f32 to vector<16x1xf32>
      %73 = arith.select %65, %71, %72 : vector<16x1xi1>, vector<16x1xf32>
      %74 = vector.shape_cast %73 : vector<16x1xf32> to vector<1x16x1xf32>
      %cst_41 = arith.constant dense<0.000000e+00> : vector<1xf32>
      %75 = vector.multi_reduction <add>, %74, %cst_41 [1, 2] : vector<1x16x1xf32> to vector<1xf32>
      %76 = vector.shape_cast %75 : vector<1xf32> to vector<1x1x1xf32>
      %77 = vector.extract %76[0, 0, 0] : f32 from vector<1x1x1xf32>
      %78 = arith.extui %65 : vector<16x1xi1> to vector<16x1xi32>
      %79 = arith.sitofp %78 : vector<16x1xi32> to vector<16x1xf32>
      %80 = vector.shape_cast %79 : vector<16x1xf32> to vector<1x16x1xf32>
      %cst_42 = arith.constant dense<0.000000e+00> : vector<1xf32>
      %81 = vector.multi_reduction <add>, %80, %cst_42 [1, 2] : vector<1x16x1xf32> to vector<1xf32>
      %82 = vector.shape_cast %81 : vector<1xf32> to vector<1x1x1xf32>
      %83 = vector.extract %82[0, 0, 0] : f32 from vector<1x1x1xf32>
      %c0_i32_43 = arith.constant 0 : i32
      %84 = arith.cmpi eq, %arg2, %c0_i32_43 : i32
      %85 = arith.extui %84 : i1 to i32
      %c0_i32_44 = arith.constant 0 : i32
      %86 = arith.cmpi ne, %85, %c0_i32_44 : i32
      scf.if %86 {
        %c0_47 = arith.constant 0 : index
        %c0_48 = arith.constant 0 : index
        %c0_49 = arith.constant 0 : index
        %90 = vector.load %arg8[%c0_47, %c0_48, %c0_49] : memref<1x1x1xf32, #tpu.memory_space<vmem>>, vector<1x1x1xf32>
        %91 = vector.broadcast %77 : f32 to vector<1x1x1xf32>
        %92 = arith.addf %90, %91 : vector<1x1x1xf32>
        %c0_50 = arith.constant 0 : index
        %c0_51 = arith.constant 0 : index
        %c0_52 = arith.constant 0 : index
        %93 = vector.load %arg8[%c0_50, %c0_51, %c0_52] : memref<1x1x1xf32, #tpu.memory_space<vmem>>, vector<1x1x1xf32>
        tpu.vector_store %arg8[%c0_50, %c0_51, %c0_52], %92 {strides = array<i32>} : memref<1x1x1xf32, #tpu.memory_space<vmem>>, vector<1x1x1xf32>,
        %c0_53 = arith.constant 0 : index
        %c0_54 = arith.constant 0 : index
        %c0_55 = arith.constant 0 : index
        %94 = vector.load %arg9[%c0_53, %c0_54, %c0_55] : memref<1x1x1xf32, #tpu.memory_space<vmem>>, vector<1x1x1xf32>
        %95 = vector.broadcast %83 : f32 to vector<1x1x1xf32>
        %96 = arith.addf %94, %95 : vector<1x1x1xf32>
        %c0_56 = arith.constant 0 : index
        %c0_57 = arith.constant 0 : index
        %c0_58 = arith.constant 0 : index
        %97 = vector.load %arg9[%c0_56, %c0_57, %c0_58] : memref<1x1x1xf32, #tpu.memory_space<vmem>>, vector<1x1x1xf32>
        tpu.vector_store %arg9[%c0_56, %c0_57, %c0_58], %96 {strides = array<i32>} : memref<1x1x1xf32, #tpu.memory_space<vmem>>, vector<1x1x1xf32>,
      } else {
      }
      %c1_i32_45 = arith.constant 1 : i32
      %87 = arith.cmpi eq, %arg2, %c1_i32_45 : i32
      %88 = arith.extui %87 : i1 to i32
      %c0_i32_46 = arith.constant 0 : i32
      %89 = arith.cmpi ne, %88, %c0_i32_46 : i32
      scf.if %89 {
        %c0_47 = arith.constant 0 : index
        %c0_48 = arith.constant 0 : index
        %c0_49 = arith.constant 0 : index
        %90 = vector.load %arg10[%c0_47, %c0_48, %c0_49] : memref<1x1x1xf32, #tpu.memory_space<vmem>>, vector<1x1x1xf32>
        %91 = vector.broadcast %77 : f32 to vector<1x1x1xf32>
        %92 = arith.addf %90, %91 : vector<1x1x1xf32>
        %c0_50 = arith.constant 0 : index
        %c0_51 = arith.constant 0 : index
        %c0_52 = arith.constant 0 : index
        %93 = vector.load %arg10[%c0_50, %c0_51, %c0_52] : memref<1x1x1xf32, #tpu.memory_space<vmem>>, vector<1x1x1xf32>
        tpu.vector_store %arg10[%c0_50, %c0_51, %c0_52], %92 {strides = array<i32>} : memref<1x1x1xf32, #tpu.memory_space<vmem>>, vector<1x1x1xf32>,
        %c0_53 = arith.constant 0 : index
        %c0_54 = arith.constant 0 : index
        %c0_55 = arith.constant 0 : index
        %94 = vector.load %arg11[%c0_53, %c0_54, %c0_55] : memref<1x1x1xf32, #tpu.memory_space<vmem>>, vector<1x1x1xf32>
        %95 = vector.broadcast %83 : f32 to vector<1x1x1xf32>
        %96 = arith.addf %94, %95 : vector<1x1x1xf32>
        %c0_56 = arith.constant 0 : index
        %c0_57 = arith.constant 0 : index
        %c0_58 = arith.constant 0 : index
        %97 = vector.load %arg11[%c0_56, %c0_57, %c0_58] : memref<1x1x1xf32, #tpu.memory_space<vmem>>, vector<1x1x1xf32>
        tpu.vector_store %arg11[%c0_56, %c0_57, %c0_58], %96 {strides = array<i32>} : memref<1x1x1xf32, #tpu.memory_space<vmem>>, vector<1x1x1xf32>,
      } else {
      }
    } else {
    }
    return
  }
  func.func @transform_0(%arg0: i32, %arg1: i32, %arg2: i32, %arg3: i32) -> (i32, i32) {
    %c1_i32 = arith.constant 1 : i32
    %0 = arith.muli %arg0, %c1_i32 : i32
    %1 = arith.addi %0, %arg1 : i32
    %c0_i32 = arith.constant 0 : i32
    %2 = arith.minsi %1, %c0_i32 : i32
    %c0_i32_0 = arith.constant 0 : i32
    %c0_i32_1 = arith.constant 0 : i32
    return %2, %c0_i32_0 : i32, i32
  }
  func.func @transform_1(%arg0: i32, %arg1: i32, %arg2: i32, %arg3: i32) -> (i32, i32, i32) {
    %c0_i32 = arith.constant 0 : i32
    %c0_i32_0 = arith.constant 0 : i32
    return %arg2, %c0_i32, %arg3 : i32, i32, i32
  }
  func.func @transform_2(%arg0: i32, %arg1: i32, %arg2: i32, %arg3: i32) -> (i32, i32, i32) {
    %c0_i32 = arith.constant 0 : i32
    %c0_i32_0 = arith.constant 0 : i32
    return %arg2, %c0_i32, %arg3 : i32, i32, i32
  }
  func.func @transform_3(%arg0: i32, %arg1: i32, %arg2: i32, %arg3: i32) -> (i32, i32, i32) {
    %c1_i32 = arith.constant 1 : i32
    %0 = arith.muli %arg0, %c1_i32 : i32
    %1 = arith.addi %0, %arg1 : i32
    %c0_i32 = arith.constant 0 : i32
    %2 = arith.minsi %1, %c0_i32 : i32
    %c0_i32_0 = arith.constant 0 : i32
    %c0_i32_1 = arith.constant 0 : i32
    return %arg2, %2, %c0_i32_0 : i32, i32, i32
  }
  func.func @transform_4(%arg0: i32, %arg1: i32, %arg2: i32, %arg3: i32) -> (i32, i32, i32) {
    %c0_i32 = arith.constant 0 : i32
    %c0_i32_0 = arith.constant 0 : i32
    %c0_i32_1 = arith.constant 0 : i32
    return %arg0, %c0_i32, %c0_i32_0 : i32, i32, i32
  }
  func.func @transform_5(%arg0: i32, %arg1: i32, %arg2: i32, %arg3: i32) -> (i32, i32, i32) {
    %c0_i32 = arith.constant 0 : i32
    %c0_i32_0 = arith.constant 0 : i32
    %c0_i32_1 = arith.constant 0 : i32
    return %arg0, %c0_i32, %c0_i32_0 : i32, i32, i32
  }
  func.func @transform_6(%arg0: i32, %arg1: i32, %arg2: i32, %arg3: i32) -> (i32, i32, i32) {
    %c0_i32 = arith.constant 0 : i32
    %c0_i32_0 = arith.constant 0 : i32
    %c0_i32_1 = arith.constant 0 : i32
    return %arg0, %c0_i32, %c0_i32_0 : i32, i32, i32
  }
  func.func @transform_7(%arg0: i32, %arg1: i32, %arg2: i32, %arg3: i32) -> (i32, i32, i32) {
    %c0_i32 = arith.constant 0 : i32
    %c0_i32_0 = arith.constant 0 : i32
    %c0_i32_1 = arith.constant 0 : i32
    return %arg0, %c0_i32, %c0_i32_0 : i32, i32, i32
  }
}

</mosaic_0001>

<bundles_post_ra>
// kernel: tpu_custom_call.1
= control target key start
LH: loop header
LB: loop body
LE: loop exit
PB: predicated region body
PF: predicated region fallthrough
CT: control target
= control target key end

     0   :  { %13 = vsyncpa [#allocation6], 0  ;;  %s1344_s0 = inlined_call_operand.hbm [shape: f32[16,32], index: 0, kind: input, shape index: {}]   ;;  %s1345_s1 = inlined_call_operand.vmem [shape: bf16[2,32,128], index: 1, kind: input, shape index: {}]   ;;  %s1346_s2 = inlined_call_operand.vmem [shape: f32[2,1,128], index: 2, kind: input, shape index: {}]   ;;  %s1347_s3 = inlined_call_operand.vmem [shape: s32[2,16,1], index: 3, kind: input, shape index: {}]   ;;  %s1348_s4 = inlined_call_operand.hbm [shape: f32[1,1,1], index: 4, kind: output, shape index: {0}]   ;;  %s1349_s5 = inlined_call_operand.hbm [shape: f32[1,1,1], index: 5, kind: output, shape index: {1}]   ;;  %s1350_s6 = inlined_call_operand.hbm [shape: f32[1,1,1], index: 6, kind: output, shape index: {2}]   ;;  %s1351_s7 = inlined_call_operand.hbm [shape: f32[1,1,1], index: 7, kind: output, shape index: {3}]  }
   0x1   :  { %14 = vsyncpa [#allocation7], 0 }
   0x2   :  { %15 = vsyncpa [#allocation10], 0 }
   0x3   :  { %16 = vsyncpa [#allocation13], 0  ;;  %s1221_s24 = smov 0   ;;  %s1223_s25 = smov 0  }
   0x4   :  { %s1225_s26 = smov 0  }
   0x5 LB: > { %s858_s27 = sadd.s32 4294967295, %s1168_s26   ;;  %s40_s28 = sadd.s32 1, %s1164_s25  ;;  %s1168_s26 = sphi %s1225_s26, %s22_s26   ;;  %s1164_s25 = sphi %s1223_s25, %s1354_s25   ;;  %s1160_s24 = sphi %s1221_s24, %s1353_s24  }
   0x6   : > { %p42_p0 = scmp.ge.s32.totalorder %s40_s28, 2  ;;  %p859_p1 = scmp.ge.s32.totalorder %s1168_s26, 1 }
   0x7   : > { %p279_p2 = scmp.lt.s32.totalorder %s1168_s26, 3  ;;  %p927_p4 = scmp.eq.s32.totalorder %s858_s27, 0 }
   0x8   : > { %s1356_s28 = smov (%p42_p0, %s40_s28), 0  ;;  %s296_s8 = sshll.u32 %s1344_s0, 4  ;;  %s297_s8 = int_to_ptr.hbm [resolvable:$true] %s296_s8 }
   0x9   : > { %p280_p3 = pnand %p859_p1, %p279_p2  ;;  %s1170_s9 = smov [#allocation5]  }
   0xa   : > { %s298_s10 = sshll.u32 %s1170_s9, 4  ;;  %s1171_s11 = smov 128   ;;  %s299_s10 = int_to_ptr.vmem [resolvable:$true] %s298_s10 }
   0xb   : > { %p923_p5 = pneg %p280_p3  ;;  %s1172_s12 = smov 8  }
   0xc   : > { %353 = sbr.rel (%p280_p3) target bundleno = 788 (0x314), region = 36 }
   0xd   : > { %p924_p6 = pnand %p927_p4, %p923_p5 }
   0xf   : > { %926 = dma.hbm_to_vmem [thread:$0]  (!%p924_p6), %s297_s8, 256, %s299_s10, [#allocation6], %s1171_s11, %s1171_s11, %s1172_s12  }
  0x11   : > { %1143 = dma.done.wait (%p927_p4), [#allocation6], 256  }
  0x12   : > { %1145 = vsyncadd (%p927_p4), [#allocation6], 4294967040  ;;  %p406_p7 = scmp.lt.s32.totalorder %s1160_s24, 1  ;;  %p438_p8 = scmp.eq.s32.totalorder %s1160_s24, 0 }
  0x13   : > { %vm446_vm0 = vcmask (%p438_p8), 0   ;;  %v1173_v0 = vmov (%p438_p8), 0.0  }
  0x14   : > { %s1250_s13 = scalar_select %p406_p7, %s1160_s24, 1  ;;  %447 = vst.msk [vmem:[#allocation8] sm:$0x1] (%p438_p8), %vm446_vm0, %v1173_v0 }
  0x15   : > { %445 = sbr.rel (!%p438_p8) target bundleno = 26 (0x1a), region = 44  ;;  %448 = vst.msk [vmem:[#allocation9] sm:$0x1] (%p438_p8), %vm446_vm0, %v1173_v0 }
  0x16   : > { %s893_s14 = sshll.u32 %s1250_s13, 4  ;;  %s419_s17 = scalar_lea.vmem %s1346_s2, %s1250_s13  ;;  %449 = vst.msk [vmem:[#allocation11] sm:$0x1] (%p438_p8), %vm446_vm0, %v1173_v0 }
  0x17   : > { %s413_s20 = scalar_lea.vmem %s1345_s1, %s893_s14  ;;  %s431_s23 = scalar_lea.vmem %s1347_s3, %s893_s14  ;;  %450 = vst.msk [vmem:[#allocation12] sm:$0x1] (%p438_p8), %vm446_vm0, %v1173_v0 }
  0x1a PF: > { %v898_v1 = vld [vmem:[%s413_s20 + $0x8] sm:$0xff]  ;;  %v897_v2 = vld [vmem:[%s413_s20] sm:$0xff]  ;;  %v1174_v3 = vmov 0   ;;  %v461_v5 = vld [vmem:[#allocation5] sm:$0xff]  ;;  %vm484_vm1 = vcmask 261120   ;;  %v556_v9 = vlaneseq  ;;  %vm454_vm3 = vcmask 7168  }
  0x1b   : > { %973 = vset.pattern.permute.xlu2 %v1174_v3  ;;  %v1263_v4 = vld [vmem:[%s431_s23] sm:$0xff]  ;;  %972 = vset.pattern.permute.xlu1 %v1174_v3  ;;  %v462_v6 = vld [vmem:[#allocation5 + $0x8] sm:$0xff]  ;;  %v1266_v8 = vld [vmem:[%s431_s23 + $0x8] sm:$0xff]  ;;  %v1175_v18 = vmov -inf   ;;  %v1176_v19 = vmov 0.0   ;;  %p881_p9 = scmp.ne.s32.totalorder %s1160_s24, 0 }
  0x1c   : > { %494 = vmatpush.bf16.msra.mxu0 %v898_v1  ;;  %563 = vperm.xlu2 %973, %v1263_v4   ;;  %v463_v7 = vpack.c.bf16 %v462_v6, %v461_v5  ;;  %v557_v10 = vand.u32 127, %v556_v9  ;;  %v975_v11 = vld [vmem:[%s419_s17] ss:$0 sm:$0xff]  ;;  %455 = vst.msk [vmem:[#allocation2] sm:$0xff] %vm454_vm3, %v1175_v18  ;;  %vm591_vm5 = vcmp.ne.s32.totalorder %v1263_v4, 4294967196  ;;  %vm592_vm6 = vcmp.ne.s32.totalorder %v1266_v8, 4294967196 }
  0x1d   : > { %974 = vset.pattern.permute.xlu0 %v1174_v3  ;;  %456 = vst.msk [vmem:[#allocation2 + $0x8] sm:$0xff] %vm454_vm3, %v1175_v18  ;;  %v879_v49 = vsel %vm591_vm5, 1.0, %v1176_v19  ;;  %v880_v54 = vsel %vm592_vm6, 1.0, %v1176_v19 }
  0x1e   : > { %457 = vst.msk [vmem:[#allocation3] sm:$0xff] %vm454_vm3, %v1176_v19  ;;  %v629_v55 = vsel %vm454_vm3, %v879_v49, 0.0  ;;  %v630_v56 = vsel %vm454_vm3, %v880_v54, 0.0 }
  0x1f   : > { %458 = vst.msk [vmem:[#allocation3 + $0x8] sm:$0xff] %vm454_vm3, %v1176_v19  ;;  %v631_v59 = vadd.f32 %v630_v56, %v629_v55 }
  0x20   : > { %495 = vmatpush.bf16.msra.mxu0 %v897_v2  ;;  %459 = vst.msk [vmem:[#allocation4] sm:$0xff] %vm454_vm3, %v1176_v19 }
  0x21   : > { %460 = vst.msk [vmem:[#allocation4 + $0x8] sm:$0xff] %vm454_vm3, %v1176_v19 }
  0x23   : > { %878 = vmatmul.msk.bf16.vlgmr.msra.gmra.mxu0 %vm484_vm1, %v463_v7  ;;  %v504_v21 = vld [vmem:[#allocation2] sm:$0xff] }
  0x24   : > { %566 = vperm.xlu2 %973, %v1266_v8   ;;  %v505_v28 = vld [vmem:[#allocation2 + $0x8] sm:$0xff] }
  0x25   : > { %v534_v53 = vld [vmem:[#allocation3] sm:$0xff] }
  0x26   : > { %v535_v52 = vld [vmem:[#allocation3 + $0x8] sm:$0xff] }
  0x27   : > { %v560_v22 = vld [vmem:[#allocation4] sm:$0xff] }
  0x28   : > { %v561_v0 = vld [vmem:[#allocation4 + $0x8] sm:$0xff] }
  0x76   : > { %v564_v12 = vpop.permute.xlu2 %563 }
  0x77   : > { %vm568_vm2 = vcmp.eq.s32.totalorder %v557_v10, %v564_v12 }
  0x7e   : > { %v567_v20 = vpop.permute.xlu2 %566 }
  0x7f   : > { %vm569_vm4 = vcmp.eq.s32.totalorder %v557_v10, %v567_v20 }
  0xa0   : > { %v497_v13 = vpop.f32.mrf.mxu0 }
  0xa1   : > { %v498_v14 = vadd.f32 %v975_v11, %v497_v13 }
  0xa3   : > { %506 = vmax.xlane.f32.xlu0 %v498_v14  ;;  %v570_v15 = vsel %vm568_vm2, %v498_v14, 0.0 }
  0xa4   : > { %572 = vadd.xlane.f32.xlu2 %v570_v15 }
  0xa8   : > { %v499_v16 = vpop.f32.mrf.mxu0 }
  0xa9   : > { %v500_v17 = vadd.f32 %v975_v11, %v499_v16 }
  0xab   : > { %508 = vmax.xlane.f32.xlu0 %v500_v17  ;;  %v571_v46 = vsel %vm569_vm4, %v500_v17, 0.0 }
 0x116   : > { %v507_v23 = vpop.xlane.xlu0 %506 }
 0x117   : > { %v510_v24 = vmax.f32 %v504_v21, %v507_v23  ;;  %v573_v25 = vpop.xlane.xlu2 %572 }
 0x118   : > { %v576_v26 = vadd.f32 %v573_v25, %v560_v22 }
 0x119   : > { %v536_v27 = vsub.f32 %v504_v21, %v510_v24  ;;  %553 = vst.msk [vmem:[#allocation2] sm:$0xff] %vm454_vm3, %v510_v24  ;;  %514 = vperm.xlu1 %972, %v510_v24  }
 0x11a   : > { %578 = vst.msk [vmem:[#allocation4] sm:$0xff] %vm454_vm3, %v576_v26 }
 0x11b   : > { %v538_v47 = vmul.f32 1.442695, %v536_v27 }
 0x11e   : > { %v509_v29 = vpop.xlane.xlu0 %508 }
 0x11f   : > { %v511_v30 = vmax.f32 %v505_v28, %v509_v29 }
 0x120   : > { %v597_v12 = vld [vmem:[#allocation2] sm:$0xff] }
 0x121   : > { %v537_v31 = vsub.f32 %v505_v28, %v511_v30  ;;  %554 = vst.msk [vmem:[#allocation2 + $0x8] sm:$0xff] %vm454_vm3, %v511_v30  ;;  %519 = vperm.xlu1 %972, %v511_v30   ;;  %v607_v16 = vld [vmem:[#allocation4] sm:$0xff] }
 0x123   : > { %v540_v48 = vmul.f32 1.442695, %v537_v31 }
 0x128   : > { %v598_v10 = vld [vmem:[#allocation2 + $0x8] sm:$0xff] }
 0x18b   : > { %v515_v32 = vpop.permute.xlu1 %514 }
 0x18c   : > { %v522_v34 = vsub.f32 %v498_v14, %v515_v32 }
 0x193   : > { %v520_v33 = vpop.permute.xlu1 %519 }
 0x194   : > { %v523_v35 = vsub.f32 %v500_v17, %v520_v33 }
 0x196   : > { %v524_v36 = vpack.c.bf16 %v523_v35, %v522_v34 }
 0x198   : > { %v525_v37 = vunpack.c.l.bf16 %v524_v36  ;;  %v526_v38 = vunpack.c.h.bf16 %v524_v36 }
 0x19a   : > { %v527_v39 = vmul.f32 1.442695, %v525_v37  ;;  %v529_v40 = vmul.f32 1.442695, %v526_v38 }
 0x19c   : > { %976 = vpow2.f32 %v527_v39 }
 0x19d   : > { %978 = vpow2.f32 %v529_v40 }
 0x19e   : > { %980 = vpow2.f32 %v538_v47 }
 0x19f   : > { %982 = vpow2.f32 %v540_v48 }
 0x1a2   : > { %v977_v41 = vpop.eup %976 }
 0x1a3   : > { %v979_v42 = vpop.eup %978 }
 0x1a4   : > { %v531_v43 = vpack.c.bf16 %v979_v42, %v977_v41  ;;  %v981_v50 = vpop.eup %980 }
 0x1a5   : > { %v983_v51 = vpop.eup %982  ;;  %v542_v58 = vmul.f32 %v981_v50, %v534_v53 }
 0x1a6   : > { %v533_v44 = vunpack.c.h.bf16 %v531_v43  ;;  %v532_v45 = vunpack.c.l.bf16 %v531_v43  ;;  %v543_v57 = vmul.f32 %v983_v51, %v535_v52 }
 0x1a8   : > { %546 = vadd.xlane.f32.xlu1 %v533_v44  ;;  %544 = vadd.xlane.f32.xlu0 %v532_v45 }
 0x1b0   : > { %574 = vadd.xlane.f32.xlu0 %v571_v46 }
 0x21b   : > { %v547_v60 = vpop.xlane.xlu1 %546  ;;  %v545_v61 = vpop.xlane.xlu0 %544 }
 0x21c   : > { %v549_v62 = vadd.f32 %v547_v60, %v543_v57  ;;  %v548_v63 = vadd.f32 %v545_v61, %v542_v58 }
 0x21e   : > { %552 = vst.msk [vmem:[#allocation3 + $0x8] sm:$0xff] %vm454_vm3, %v549_v62 }
 0x21f   : > { %551 = vst.msk [vmem:[#allocation3] sm:$0xff] %vm454_vm3, %v548_v63 }
 0x223   : > { %v575_v1 = vpop.xlane.xlu0 %574 }
 0x224   : > { %v577_v2 = vadd.f32 %v575_v1, %v561_v0 }
 0x225   : > { %v600_v3 = vld [vmem:[#allocation3 + $0x8] sm:$0xff] }
 0x226   : > { %579 = vst.msk [vmem:[#allocation4 + $0x8] sm:$0xff] %vm454_vm3, %v577_v2  ;;  %v599_v5 = vld [vmem:[#allocation3] sm:$0xff]  ;;  %984 = vlog2.f32 %v600_v3 }
 0x227   : > { %986 = vlog2.f32 %v599_v5 }
 0x22c   : > { %v985_v6 = vpop.eup %984 }
 0x22d   : > { %v987_v7 = vpop.eup %986  ;;  %v604_v9 = vmul.f32 0.6931472, %v985_v6  ;;  %v608_v15 = vld [vmem:[#allocation4 + $0x8] sm:$0xff] }
 0x22e   : > { %v602_v11 = vmul.f32 0.6931472, %v987_v7 }
 0x22f   : > { %v606_v13 = vadd.f32 %v604_v9, %v598_v10 }
 0x230   : > { %v605_v14 = vadd.f32 %v602_v11, %v597_v12 }
 0x231   : > { %v610_v17 = vsub.f32 %v606_v13, %v608_v15 }
 0x232   : > { %v609_v18 = vsub.f32 %v605_v14, %v607_v16 }
 0x233   : > { %v612_v19 = vsel %vm592_vm6, %v610_v17, 0.0 }
 0x234   : > { %v611_v20 = vsel %vm591_vm5, %v609_v18, 0.0  ;;  %v614_v21 = vsel %vm454_vm3, %v612_v19, 0.0 }
 0x235   : > { %v613_v22 = vsel %vm454_vm3, %v611_v20, 0.0 }
 0x236   : > { %v615_v23 = vadd.f32 %v614_v21, %v613_v22 }
 0x238   : > { %616 = vadd.xlane.f32.xlu0 %v615_v23 }
 0x240   : > { %632 = vadd.xlane.f32.xlu0 %v631_v59 }
 0x2ab   : > { %v617_v24 = vpop.xlane.xlu0 %616 }
 0x2ac   : > { %v618_v25 = vrot.slane %v617_v24, 4 }
 0x2ae   : > { %v619_v26 = vadd.f32 %v618_v25, %v617_v24 }
 0x2b0   : > { %v620_v27 = vrot.slane %v619_v26, 2 }
 0x2b2   : > { %v621_v28 = vadd.f32 %v620_v27, %v619_v26 }
 0x2b3   : > { %v633_v29 = vpop.xlane.xlu0 %632 }
 0x2b4   : > { %v634_v30 = vrot.slane %v633_v29, 4  ;;  %v622_v31 = vrot.slane %v621_v28, 1 }
 0x2b6   : > { %v635_v8 = vadd.f32 %v634_v30, %v633_v29  ;;  %v623_v32 = vadd.f32 %v622_v31, %v621_v28 }
 0x2b8   : > { %v636_v33 = vrot.slane %v635_v8, 2  ;;  %899 = vpush %v623_v32 }
 0x2ba   : > { %v637_v4 = vadd.f32 %v636_v33, %v635_v8 }
 0x2bc   : > { %v638_v34 = vrot.slane %v637_v4, 1 }
 0x2be   : > { %v639_v35 = vadd.f32 %v638_v34, %v637_v4 }
 0x2c0   : > { %901 = vpush %v639_v35 }
 0x2e9   : > { %s900_s29 = spop %899 }
 0x2ed   : > { %643 = sbr.rel (%p881_p9) target bundleno = 759 (0x2f7), region = 56 }
 0x2f1   : > { %s902_s30 = spop %901 }
 0x2f2   : > { %v644_v36 = vld [vmem:[#allocation8] sm:$0x1]  ;;  %v645_v37 = vstv %s900_s29  ;;  %vm647_vm7 = vcmask 0   ;;  %v649_v38 = vld [vmem:[#allocation9] sm:$0x1]  ;;  %v650_v39 = vstv %s902_s30 }
 0x2f3   : > { %v646_v40 = vadd.f32 %v645_v37, %v644_v36  ;;  %v651_v41 = vadd.f32 %v650_v39, %v649_v38 }
 0x2f5   : > { %648 = vst.msk [vmem:[#allocation8] sm:$0x1] %vm647_vm7, %v646_v40 }
 0x2f6   : > { %652 = vst.msk [vmem:[#allocation9] sm:$0x1] %vm647_vm7, %v651_v41 }
 0x2f7 PF: > { %p882_p10 = scmp.ne.s32.totalorder %s1160_s24, 1 }
 0x2f9   : > { %656 = sbr.rel (%p882_p10) target bundleno = 771 (0x303), region = 60 }
 0x2fe   : > { %v657_v42 = vld [vmem:[#allocation11] sm:$0x1]  ;;  %v658_v43 = vstv %s900_s29  ;;  %vm660_vm8 = vcmask 0   ;;  %v662_v44 = vld [vmem:[#allocation12] sm:$0x1]  ;;  %v663_v45 = vstv %s902_s30 }
 0x2ff   : > { %v659_v46 = vadd.f32 %v658_v43, %v657_v42  ;;  %v664_v47 = vadd.f32 %v663_v45, %v662_v44 }
 0x301   : > { %661 = vst.msk [vmem:[#allocation11] sm:$0x1] %vm660_vm8, %v659_v46 }
 0x302   : > { %665 = vst.msk [vmem:[#allocation12] sm:$0x1] %vm660_vm8, %v664_v47 }
 0x303 PF: > { %p1299_p11 = scmp.eq.s32.totalorder %s858_s27, 1  ;;  %s1177_s24 = smov [#allocation9]  }
 0x304   : > { %s686_s9 = sshll.u32 %s1177_s24, 4  ;;  %s688_s12 = sshll.u32 %s1349_s5, 4  ;;  %s687_s9 = int_to_ptr.vmem [resolvable:$true] %s686_s9  ;;  %s689_s12 = int_to_ptr.hbm [resolvable:$true] %s688_s12 }
 0x305   : > { %910 = dma.vmem_to_hbm [thread:$0]  (%p1299_p11), %s687_s9, 16, %s689_s12, [#allocation10]  }
 0x306   : > { %s1178_s13 = smov [#allocation8]   ;;  %s675_s16 = sshll.u32 %s1348_s4, 4  ;;  %s676_s16 = int_to_ptr.hbm [resolvable:$true] %s675_s16 }
 0x307   : > { %s673_s14 = sshll.u32 %s1178_s13, 4  ;;  %s701_s19 = sshll.u32 %s1350_s6, 4  ;;  %s674_s14 = int_to_ptr.vmem [resolvable:$true] %s673_s14  ;;  %s702_s19 = int_to_ptr.hbm [resolvable:$true] %s701_s19 }
 0x308   : > { %908 = dma.vmem_to_hbm [thread:$0]  (%p1299_p11), %s674_s14, 16, %s676_s16, [#allocation7]  }
 0x309   : > { %s1179_s20 = smov [#allocation11]   ;;  %s1180_s22 = smov [#allocation12]  }
 0x30a   : > { %s699_s21 = sshll.u32 %s1179_s20, 4  ;;  %s712_s23 = sshll.u32 %s1180_s22, 4  ;;  %s700_s21 = int_to_ptr.vmem [resolvable:$true] %s699_s21  ;;  %s713_s23 = int_to_ptr.vmem [resolvable:$true] %s712_s23 }
 0x30b   : > { %912 = dma.vmem_to_hbm [thread:$0]  (%p1299_p11), %s700_s21, 16, %s702_s19, [#allocation10]  }
 0x30c   : > { %s714_s24 = sshll.u32 %s1351_s7, 4  ;;  %s715_s24 = int_to_ptr.hbm [resolvable:$true] %s714_s24 }
 0x30d   : > { %914 = dma.vmem_to_hbm [thread:$0]  (%p1299_p11), %s713_s23, 16, %s715_s24, [#allocation13]  }
 0x30e   : > { %1147 = dma.done.wait (%p1299_p11), [#allocation7], 16  }
 0x30f   : > { %1149 = vsyncadd (%p1299_p11), [#allocation7], 4294967280 }
 0x310   : > { %1151 = dma.done.wait (%p1299_p11), [#allocation10], 32  }
 0x311   : > { %1153 = vsyncadd (%p1299_p11), [#allocation10], 4294967264 }
 0x312   : > { %1155 = dma.done.wait (%p1299_p11), [#allocation13], 16  }
 0x313   : > { %1157 = vsyncadd (%p1299_p11), [#allocation13], 4294967280 }
 0x314 PF: > { %s22_s26 = sadd.s32 1, %s1168_s26   ;;  %s1353_s24 = smov %s1164_s25 }
 0x315   : > { %p19_p12 = scmp.ge.s32.totalorder %s22_s26, 4   ;;  %s1354_s25 = smov %s1356_s28 }
 0x317   :  { %21 = sbr.rel (!%p19_p12) target bundleno = 5 (0x5), region = 123 }
 0x31c   :  { %743 = vsyncpa [#allocation6], 1 }
 0x31d   :  { %745 = vsyncpa [#allocation6 + $0x1], 1 }
 0x31e   :  { %746 = vsyncpa [#allocation7], 1 }
 0x31f   :  { %748 = vsyncpa [#allocation7 + $0x1], 1 }
 0x320   :  { %749 = vsyncpa [#allocation10], 1 }
 0x321   :  { %750 = vsyncpa [#allocation13], 1 }

</bundles_post_ra>
